<compile_context>
chip_gen: v7x
topology: tpu7x:2x2x1
jax: 0.10.0
libtpu: 0.0.40
codegen_flags: <defaults>
</compile_context>

<pallas_src>
import jax
import jax.numpy as jnp
from jax.experimental import pallas as pl


def policy_kernel(x_ref, w1_ref, b1_ref, w2t_ref, b2_ref, o_ref):
    # x: (1, B)   w1: (H, 1)   b1: (H, 1)   w2t: (H, A)   b2: (A, 1)   o: (A, B)
    x = x_ref[...]                           # (1, B) lane-dense states
    w1 = w1_ref[...]                         # (H, 1)
    b1 = b1_ref[...]                         # (H, 1)

    # fc1 + ReLU on the VPU: (H,1)*(1,B) broadcast == (x @ W1^T)^T, no MXU.
    h = jnp.maximum(w1 * x + b1, 0.0)        # (H, B)

    # fc2 on VPU + XLU: per-action weighted reduction over the H (sublane) axis.
    w2t = w2t_ref[...]                       # (H, A)
    b2 = b2_ref[...]                         # (A, 1)
    n_act = w2t_ref.shape[1]
    rows = [
        jnp.sum(w2t[:, a:a + 1] * h, axis=0, keepdims=True)   # (1, B)
        for a in range(n_act)
    ]
    logits_t = jnp.concatenate(rows, axis=0) + b2              # (A, B)

    # softmax over the original dim=0 (batch) == the lane axis here.
    m = jnp.max(logits_t, axis=1, keepdims=True)               # (A, 1)
    e = jnp.exp(logits_t - m)                                  # (A, B)
    denom = jnp.sum(e, axis=1, keepdims=True)                  # (A, 1)
    o_ref[...] = e * pl.reciprocal(denom)    # exact reciprocal (approx=False)


def policy_forward(x, w1, b1, w2, b2):
    """x: (B, 1); w1: (H, 1); b1: (H,); w2: (A, H); b2: (A,)  ->  (B, A)."""
    if x.dtype != jnp.float32:
        x = x.astype(jnp.float32)
    B = x.shape[0]
    H = w1.shape[0]   # 128
    A = w2.shape[0]   # 4

    # Layout plumbing (plain JAX): batch on lanes, features on sublanes.
    x_row = x.reshape(1, B)        # (1, B)  == x.T
    w1_col = w1.reshape(H, 1)      # (H, 1)
    b1_col = b1.reshape(H, 1)      # (H, 1)
    w2t = w2.T                     # (H, A)
    b2_col = b2.reshape(A, 1)      # (A, 1)

    full = lambda shape: pl.BlockSpec(shape, lambda: (0,) * len(shape))

    out_t = pl.pallas_call(
        policy_kernel,
        out_shape=jax.ShapeDtypeStruct((A, B), jnp.float32),
        grid=(),
        in_specs=[
            full((1, B)),
            full((H, 1)),
            full((H, 1)),
            full((H, A)),
            full((A, 1)),
        ],
        out_specs=full((A, B)),
    )(x_row, w1_col, b1_col, w2t, b2_col)

    # Transpose back to the PyTorch (B, A) layout outside the kernel.
    return out_t.T


def _ref_forward(x, w1, b1, w2, b2):
    hi = jax.lax.Precision.HIGHEST
    h = jnp.maximum(jnp.dot(x, w1.T, precision=hi) + b1, 0.0)
    logits = jnp.dot(h, w2.T, precision=hi) + b2
    return jax.nn.softmax(logits, axis=0)


def _check(B, key):
    k_x, k_w1, k_b1, k_w2, k_b2 = jax.random.split(key, 5)
    IN, H, A = 1, 128, 4

    # PyTorch nn.Linear default init: U(-1/sqrt(fan_in), 1/sqrt(fan_in)).
    bound1 = 1.0 / jnp.sqrt(jnp.float32(IN))
    bound2 = 1.0 / jnp.sqrt(jnp.float32(H))
    w1 = jax.random.uniform(k_w1, (H, IN), jnp.float32, -bound1, bound1)
    b1 = jax.random.uniform(k_b1, (H,), jnp.float32, -bound1, bound1)
    w2 = jax.random.uniform(k_w2, (A, H), jnp.float32, -bound2, bound2)
    b2 = jax.random.uniform(k_b2, (A,), jnp.float32, -bound2, bound2)
    x = jax.random.normal(k_x, (B, IN), jnp.float32)

    out = jax.block_until_ready(policy_forward(x, w1, b1, w2, b2))
    ref = _ref_forward(x, w1, b1, w2, b2)

    assert out.shape == (B, A)
    assert jnp.allclose(out, ref, atol=1e-5, rtol=1e-5), (
        f"Pallas output mismatch vs JAX reference at B={B}")
    # Columns sum to 1 because the softmax is over dim=0 (the batch axis).
    assert jnp.allclose(jnp.sum(out, axis=0), jnp.ones((A,)), atol=1e-5)


if __name__ == "__main__":
    key = jax.random.PRNGKey(0)
    k_big, k_small = jax.random.split(key, 2)
    # Lane-dense batch: 128 states per call amortizes dispatch and makes every
    # load/store a full-lane op; also verify the original small batch of 8.
    _check(128, k_big)
    _check(8, k_small)
    print("KERNEL_OK")
</pallas_src>

<mosaic_0001>
module attributes {stable_mosaic.version = 11 : i64} {
  func.func @policy_kernel(%arg0: memref<1x128xf32, #tpu.memory_space<vmem>>, %arg1: memref<128x1xf32, #tpu.memory_space<vmem>>, %arg2: memref<128x1xf32, #tpu.memory_space<vmem>>, %arg3: memref<128x4xf32, #tpu.memory_space<vmem>>, %arg4: memref<4x1xf32, #tpu.memory_space<vmem>>, %arg5: memref<4x128xf32, #tpu.memory_space<vmem>>) attributes {dimension_semantics = [], scalar_prefetch = 0 : i64, scratch_operands = 0 : i64, tpu.core_type = #tpu.core_type<tc>} {
    %c0 = arith.constant 0 : index
    %c0_0 = arith.constant 0 : index
    %0 = vector.load %arg0[%c0, %c0_0] : memref<1x128xf32, #tpu.memory_space<vmem>>, vector<1x128xf32>
    %c0_1 = arith.constant 0 : index
    %c0_2 = arith.constant 0 : index
    %1 = vector.load %arg1[%c0_1, %c0_2] : memref<128x1xf32, #tpu.memory_space<vmem>>, vector<128x1xf32>
    %c0_3 = arith.constant 0 : index
    %c0_4 = arith.constant 0 : index
    %2 = vector.load %arg2[%c0_3, %c0_4] : memref<128x1xf32, #tpu.memory_space<vmem>>, vector<128x1xf32>
    %3 = vector.broadcast %1 : vector<128x1xf32> to vector<128x128xf32>
    %4 = vector.broadcast %0 : vector<1x128xf32> to vector<128x128xf32>
    %5 = arith.mulf %3, %4 : vector<128x128xf32>
    %6 = vector.broadcast %2 : vector<128x1xf32> to vector<128x128xf32>
    %7 = arith.addf %5, %6 : vector<128x128xf32>
    %cst = arith.constant 0.000000e+00 : f32
    %8 = vector.broadcast %cst : f32 to vector<128x128xf32>
    %9 = arith.maximumf %7, %8 : vector<128x128xf32>
    %c0_5 = arith.constant 0 : index
    %c0_6 = arith.constant 0 : index
    %10 = vector.load %arg3[%c0_5, %c0_6] : memref<128x4xf32, #tpu.memory_space<vmem>>, vector<128x4xf32>
    %c0_7 = arith.constant 0 : index
    %c0_8 = arith.constant 0 : index
    %11 = vector.load %arg4[%c0_7, %c0_8] : memref<4x1xf32, #tpu.memory_space<vmem>>, vector<4x1xf32>
    %12 = vector.extract_strided_slice %10 {offsets = [0, 0], sizes = [128, 1], strides = [1, 1]} : vector<128x4xf32> to vector<128x1xf32>
    %13 = vector.broadcast %12 : vector<128x1xf32> to vector<128x128xf32>
    %14 = arith.mulf %13, %9 : vector<128x128xf32>
    %cst_9 = arith.constant dense<0.000000e+00> : vector<128xf32>
    %15 = vector.multi_reduction <add>, %14, %cst_9 [0] : vector<128x128xf32> to vector<128xf32>
    %16 = vector.shape_cast %15 : vector<128xf32> to vector<1x128xf32>
    %17 = vector.extract_strided_slice %10 {offsets = [0, 1], sizes = [128, 1], strides = [1, 1]} : vector<128x4xf32> to vector<128x1xf32>
    %18 = vector.broadcast %17 : vector<128x1xf32> to vector<128x128xf32>
    %19 = arith.mulf %18, %9 : vector<128x128xf32>
    %cst_10 = arith.constant dense<0.000000e+00> : vector<128xf32>
    %20 = vector.multi_reduction <add>, %19, %cst_10 [0] : vector<128x128xf32> to vector<128xf32>
    %21 = vector.shape_cast %20 : vector<128xf32> to vector<1x128xf32>
    %22 = vector.extract_strided_slice %10 {offsets = [0, 2], sizes = [128, 1], strides = [1, 1]} : vector<128x4xf32> to vector<128x1xf32>
    %23 = vector.broadcast %22 : vector<128x1xf32> to vector<128x128xf32>
    %24 = arith.mulf %23, %9 : vector<128x128xf32>
    %cst_11 = arith.constant dense<0.000000e+00> : vector<128xf32>
    %25 = vector.multi_reduction <add>, %24, %cst_11 [0] : vector<128x128xf32> to vector<128xf32>
    %26 = vector.shape_cast %25 : vector<128xf32> to vector<1x128xf32>
    %27 = vector.extract_strided_slice %10 {offsets = [0, 3], sizes = [128, 1], strides = [1, 1]} : vector<128x4xf32> to vector<128x1xf32>
    %28 = vector.broadcast %27 : vector<128x1xf32> to vector<128x128xf32>
    %29 = arith.mulf %28, %9 : vector<128x128xf32>
    %cst_12 = arith.constant dense<0.000000e+00> : vector<128xf32>
    %30 = vector.multi_reduction <add>, %29, %cst_12 [0] : vector<128x128xf32> to vector<128xf32>
    %31 = vector.shape_cast %30 : vector<128xf32> to vector<1x128xf32>
    %32 = tpu.concatenate %16, %21, %26, %31 in 0 : vector<1x128xf32>, vector<1x128xf32>, vector<1x128xf32>, vector<1x128xf32> -> vector<4x128xf32>
    %33 = vector.broadcast %11 : vector<4x1xf32> to vector<4x128xf32>
    %34 = arith.addf %32, %33 : vector<4x128xf32>
    %cst_13 = arith.constant dense<0xFF800000> : vector<4xf32>
    %35 = vector.multi_reduction <maximumf>, %34, %cst_13 [1] : vector<4x128xf32> to vector<4xf32>
    %36 = vector.shape_cast %35 : vector<4xf32> to vector<4x1xf32>
    %37 = vector.broadcast %36 : vector<4x1xf32> to vector<4x128xf32>
    %38 = arith.subf %34, %37 : vector<4x128xf32>
    %39 = math.exp %38 : vector<4x128xf32>
    %cst_14 = arith.constant dense<0.000000e+00> : vector<4xf32>
    %40 = vector.multi_reduction <add>, %39, %cst_14 [1] : vector<4x128xf32> to vector<4xf32>
    %41 = vector.shape_cast %40 : vector<4xf32> to vector<4x1xf32>
    %42 = tpu.reciprocal %41 : vector<4x1xf32> -> vector<4x1xf32>
    %43 = vector.broadcast %42 : vector<4x1xf32> to vector<4x128xf32>
    %44 = arith.mulf %39, %43 : vector<4x128xf32>
    %c0_15 = arith.constant 0 : index
    %c0_16 = arith.constant 0 : index
    %45 = vector.load %arg5[%c0_15, %c0_16] : memref<4x128xf32, #tpu.memory_space<vmem>>, vector<4x128xf32>
    tpu.vector_store %arg5[%c0_15, %c0_16], %44 {strides = array<i32>} : memref<4x128xf32, #tpu.memory_space<vmem>>, vector<4x128xf32>,
    return
  }
}

</mosaic_0001>

<bundles_post_ra>
// kernel: tpu_custom_call.1
= control target key start
LH: loop header
LB: loop body
LE: loop exit
PB: predicated region body
PF: predicated region fallthrough
CT: control target
= control target key end

     0   :  { %v828_v2 = vmov 3   ;;  %v829_v3 = vmov 0   ;;  %s1246_s0 = inlined_call_operand.vmem [shape: f32[1,128], index: 0, kind: input, shape index: {}]   ;;  %s1247_s1 = inlined_call_operand.vmem [shape: f32[128,1], index: 1, kind: input, shape index: {}]   ;;  %s1248_s2 = inlined_call_operand.vmem [shape: f32[128,1], index: 2, kind: input, shape index: {}]   ;;  %s1249_s3 = inlined_call_operand.vmem [shape: f32[128,4], index: 3, kind: input, shape index: {}]   ;;  %s1250_s4 = inlined_call_operand.vmem [shape: f32[4,1], index: 4, kind: input, shape index: {}]   ;;  %s1251_s5 = inlined_call_operand.hbm [shape: f32[4,128], index: 5, kind: output, shape index: {}]  }
   0x1   :  { %v866_v0 = vld [vmem:[%s1249_s3] sm:$0xff]  ;;  %v24_v1 = vld [vmem:[%s1247_s1 + $0x10] sm:$0xff]  ;;  %755 = vset.pattern.permute.xlu0 %v828_v2  ;;  %750 = vset.pattern.permute.xlu1 %v829_v3  ;;  %v877_v4 = vld [vmem:[%s1249_s3 + $0x18] sm:$0xff] }
   0x2   :  { %605 = vperm.xlu0 %755, %v866_v0   ;;  %66 = vperm.xlu1 %750, %v24_v1   ;;  %v25_v5 = vld [vmem:[%s1247_s1 + $0x18] sm:$0xff]  ;;  %v886_v6 = vld [vmem:[%s1249_s3 + $0x30] sm:$0xff]  ;;  %v27_v7 = vld [vmem:[%s1247_s1 + $0x28] sm:$0xff] }
   0x3   :  { %v29_v8 = vld [vmem:[%s1247_s1 + $0x38] sm:$0xff]  ;;  %v22_v9 = vld [vmem:[%s1247_s1] sm:$0xff] }
   0x6   :  { %617 = vperm.xlu0 %755, %v877_v4   ;;  %71 = vperm.xlu1 %750, %v25_v5  }
   0xa   :  { %629 = vperm.xlu0 %755, %v886_v6   ;;  %81 = vperm.xlu1 %750, %v27_v7  }
   0xe   :  { %770 = vset.pattern.permute.xlu0 %v829_v3  ;;  %91 = vperm.xlu1 %750, %v29_v8  }
   0xf   :  { %10 = vsyncpa [#allocation3], 0  ;;  %56 = vperm.xlu0 %770, %v22_v9   ;;  %v31_v10 = vld [vmem:[%s1247_s1 + $0x48] sm:$0xff]  ;;  %v33_v12 = vld [vmem:[%s1247_s1 + $0x58] sm:$0xff]  ;;  %v830_v35 = vmov 1   ;;  %v831_v37 = vmov 2  }
  0x10   :  { %v23_v11 = vld [vmem:[%s1247_s1 + $0x8] sm:$0xff]  ;;  %v26_v13 = vld [vmem:[%s1247_s1 + $0x20] sm:$0xff]  ;;  %v28_v15 = vld [vmem:[%s1247_s1 + $0x30] sm:$0xff]  ;;  %vm705_vm0 = vcmask 1040384   ;;  %vm707_vm1 = vcmask 1041408   ;;  %vm709_vm2 = vcmask 1042432  }
  0x11   :  { %v35_v14 = vld [vmem:[%s1247_s1 + $0x68] sm:$0xff]  ;;  %v37_v16 = vld [vmem:[%s1247_s1 + $0x78] sm:$0xff]  ;;  %v30_v17 = vld [vmem:[%s1247_s1 + $0x40] sm:$0xff]  ;;  %vm717_vm3 = vcmask 1043456  }
  0x12   :  { %101 = vperm.xlu1 %750, %v31_v10   ;;  %v39_v18 = vld [vmem:[%s1248_s2 + $0x8] sm:$0xff]  ;;  %v32_v19 = vld [vmem:[%s1247_s1 + $0x50] sm:$0xff]  ;;  %v41_v20 = vld [vmem:[%s1248_s2 + $0x18] sm:$0xff] }
  0x13   :  { %61 = vperm.xlu0 %770, %v23_v11   ;;  %v34_v21 = vld [vmem:[%s1247_s1 + $0x60] sm:$0xff]  ;;  %v43_v22 = vld [vmem:[%s1248_s2 + $0x28] sm:$0xff]  ;;  %v36_v23 = vld [vmem:[%s1247_s1 + $0x70] sm:$0xff] }
  0x14   :  { %v45_v24 = vld [vmem:[%s1248_s2 + $0x38] sm:$0xff]  ;;  %v38_v25 = vld [vmem:[%s1248_s2] sm:$0xff]  ;;  %v47_v26 = vld [vmem:[%s1248_s2 + $0x48] sm:$0xff] }
  0x15   :  { %v40_v27 = vld [vmem:[%s1248_s2 + $0x10] sm:$0xff]  ;;  %v49_v28 = vld [vmem:[%s1248_s2 + $0x58] sm:$0xff]  ;;  %v42_v29 = vld [vmem:[%s1248_s2 + $0x20] sm:$0xff] }
  0x16   :  { %111 = vperm.xlu1 %750, %v33_v12   ;;  %v51_v30 = vld [vmem:[%s1248_s2 + $0x68] sm:$0xff]  ;;  %v44_v31 = vld [vmem:[%s1248_s2 + $0x30] sm:$0xff]  ;;  %v46_v33 = vld [vmem:[%s1248_s2 + $0x40] sm:$0xff] }
  0x17   :  { %76 = vperm.xlu0 %770, %v26_v13   ;;  %v269_v32 = vld [vmem:[%s1249_s3 + $0x8] sm:$0xff]  ;;  %v48_v34 = vld [vmem:[%s1248_s2 + $0x50] sm:$0xff]  ;;  %v50_v36 = vld [vmem:[%s1248_s2 + $0x60] sm:$0xff] }
  0x18   :  { %v270_v38 = vld [vmem:[%s1249_s3 + $0x10] sm:$0xff]  ;;  %v991_v39 = vld [vmem:[%s1249_s3 + $0x48] sm:$0xff]  ;;  %v272_v42 = vld [vmem:[%s1249_s3 + $0x20] sm:$0xff] }
  0x19   :  { %v52_v40 = vld [vmem:[%s1248_s2 + $0x70] sm:$0xff]  ;;  %v1002_v41 = vld [vmem:[%s1249_s3 + $0x68] sm:$0xff]  ;;  %v1029_v44 = vld [vmem:[%s1249_s3 + $0x40] sm:$0xff] }
  0x1a   :  { %121 = vperm.xlu1 %750, %v35_v14   ;;  %v273_v43 = vld [vmem:[%s1249_s3 + $0x28] sm:$0xff]  ;;  %v1037_v47 = vld [vmem:[%s1249_s3 + $0x58] sm:$0xff]  ;;  %v1090_v7 = vld [vmem:[%s1246_s0] ss:$0 sm:$0xff] }
  0x1b   :  { %86 = vperm.xlu0 %770, %v28_v15   ;;  %v1048_v50 = vld [vmem:[%s1249_s3 + $0x78] sm:$0xff] }
  0x1c   :  { %v275_v55 = vld [vmem:[%s1249_s3 + $0x38] sm:$0xff] }
  0x1e   :  { %131 = vperm.xlu1 %750, %v37_v16  }
  0x1f   :  { %96 = vperm.xlu0 %770, %v30_v17  }
  0x22   :  { %163 = vperm.xlu1 %750, %v39_v18  }
  0x23   :  { %106 = vperm.xlu0 %770, %v32_v19  }
  0x26   :  { %173 = vperm.xlu1 %750, %v41_v20  }
  0x27   :  { %116 = vperm.xlu0 %770, %v34_v21  }
  0x2a   :  { %183 = vperm.xlu1 %750, %v43_v22  }
  0x2b   :  { %126 = vperm.xlu0 %770, %v36_v23  }
  0x2e   :  { %193 = vperm.xlu1 %750, %v45_v24   ;;  %v278_v24 = vld [vmem:[%s1249_s3 + $0x50] sm:$0xff] }
  0x2f   :  { %158 = vperm.xlu0 %770, %v38_v25  }
  0x32   :  { %203 = vperm.xlu1 %750, %v47_v26  }
  0x33   :  { %168 = vperm.xlu0 %770, %v40_v27  }
  0x36   :  { %213 = vperm.xlu1 %750, %v49_v28  }
  0x37   :  { %178 = vperm.xlu0 %770, %v42_v29  }
  0x3a   :  { %223 = vperm.xlu1 %750, %v51_v30  }
  0x3b   :  { %188 = vperm.xlu0 %770, %v44_v31  }
  0x3e   :  { %292 = vperm.xlu1 %750, %v269_v32  }
  0x3f   :  { %198 = vperm.xlu0 %770, %v46_v33  }
  0x42   :  { %751 = vset.pattern.permute.xlu1 %v830_v35 }
  0x43   :  { %407 = vperm.xlu1 %751, %v269_v32   ;;  %208 = vperm.xlu0 %770, %v48_v34  }
  0x47   :  { %752 = vset.pattern.permute.xlu1 %v831_v37  ;;  %218 = vperm.xlu0 %770, %v50_v36  }
  0x48   :  { %504 = vperm.xlu1 %752, %v866_v0  }
  0x4b   :  { %287 = vperm.xlu0 %770, %v866_v0  }
  0x4c   :  { %753 = vset.pattern.permute.xlu1 %v829_v3 }
  0x4d   :  { %297 = vperm.xlu1 %753, %v270_v38  }
  0x4f   :  { %302 = vperm.xlu0 %770, %v877_v4  }
  0x51   :  { %754 = vset.pattern.permute.xlu1 %v830_v35 }
  0x52   :  { %411 = vperm.xlu1 %754, %v270_v38  }
  0x53   :  { %317 = vperm.xlu0 %770, %v886_v6  }
  0x56   :  { %756 = vset.pattern.permute.xlu1 %v828_v2 }
  0x57   :  { %609 = vperm.xlu1 %756, %v269_v32   ;;  %332 = vperm.xlu0 %770, %v991_v39  }
  0x5b   :  { %757 = vset.pattern.permute.xlu1 %v831_v37  ;;  %228 = vperm.xlu0 %770, %v52_v40  }
  0x5c   :  { %512 = vperm.xlu1 %757, %v270_v38  }
  0x5f   :  { %352 = vperm.xlu0 %770, %v1002_v41  }
  0x60   :  { %758 = vset.pattern.permute.xlu1 %v830_v35 }
  0x61   :  { %415 = vperm.xlu1 %758, %v877_v4  }
  0x63   :  { %787 = vset.pattern.permute.xlu0 %v831_v37 }
  0x64   :  { %508 = vperm.xlu0 %787, %v269_v32  }
  0x65   :  { %759 = vset.pattern.permute.xlu1 %v828_v2 }
  0x66   :  { %613 = vperm.xlu1 %759, %v270_v38  }
  0x68   :  { %516 = vperm.xlu0 %787, %v877_v4  }
  0x6a   :  { %760 = vset.pattern.permute.xlu1 %v829_v3 }
  0x6b   :  { %307 = vperm.xlu1 %760, %v272_v42  }
  0x6c   :  { %528 = vperm.xlu0 %787, %v886_v6  }
  0x6f   :  { %761 = vset.pattern.permute.xlu1 %v830_v35 }
  0x70   :  { %419 = vperm.xlu1 %761, %v272_v42   ;;  %540 = vperm.xlu0 %787, %v991_v39  }
  0x74   :  { %762 = vset.pattern.permute.xlu1 %v831_v37  ;;  %556 = vperm.xlu0 %787, %v1002_v41  }
  0x75   :  { %520 = vperm.xlu1 %762, %v272_v42  }
  0x78   :  { %790 = vset.pattern.permute.xlu0 %v830_v35 }
  0x79   :  { %763 = vset.pattern.permute.xlu1 %v829_v3  ;;  %403 = vperm.xlu0 %790, %v866_v0  }
  0x7a   :  { %312 = vperm.xlu1 %763, %v273_v43  }
  0x7d   :  { %423 = vperm.xlu0 %790, %v273_v43  }
  0x7e   :  { %764 = vset.pattern.permute.xlu1 %v828_v2 }
  0x7f   :  { %621 = vperm.xlu1 %764, %v272_v42  }
  0x81   :  { %v1031_v45 = vpop.permute.xlu1 %66  ;;  %435 = vperm.xlu0 %790, %v1029_v44   ;;  %v606_v46 = vpop.permute.xlu0 %605 }
  0x83   :  { %765 = vset.pattern.permute.xlu1 %v831_v37 }
  0x84   :  { %524 = vperm.xlu1 %765, %v273_v43  }
  0x85   :  { %v1040_v48 = vpop.permute.xlu1 %71  ;;  %447 = vperm.xlu0 %790, %v1037_v47   ;;  %v1043_v49 = vpop.permute.xlu0 %617 }
  0x88   :  { %766 = vset.pattern.permute.xlu1 %v830_v35 }
  0x89   :  { %427 = vperm.xlu1 %766, %v886_v6   ;;  %v1052_v51 = vpop.permute.xlu1 %81  ;;  %463 = vperm.xlu0 %790, %v1048_v50   ;;  %v1055_v52 = vpop.permute.xlu0 %629 }
  0x8d   :  { %767 = vset.pattern.permute.xlu1 %v828_v2  ;;  %v1058_v53 = vpop.permute.xlu1 %91  ;;  %795 = vset.pattern.permute.xlu0 %v828_v2 }
  0x8e   :  { %625 = vperm.xlu1 %767, %v273_v43   ;;  %641 = vperm.xlu0 %795, %v991_v39   ;;  %v57_v54 = vpop.permute.xlu0 %56 }
  0x8f   :  { %v140_v9 = vmul.f32 %v1090_v7, %v57_v54 }
  0x91   :  { %v1065_v56 = vpop.permute.xlu1 %101 }
  0x92   :  { %768 = vset.pattern.permute.xlu1 %v829_v3  ;;  %649 = vperm.xlu0 %795, %v1037_v47   ;;  %v62_v57 = vpop.permute.xlu0 %61 }
  0x93   :  { %322 = vperm.xlu1 %768, %v275_v55   ;;  %v141_v18 = vmul.f32 %v1090_v7, %v62_v57 }
  0x95   :  { %v1069_v58 = vpop.permute.xlu1 %111 }
  0x96   :  { %657 = vperm.xlu0 %795, %v1002_v41   ;;  %v77_v59 = vpop.permute.xlu0 %76 }
  0x97   :  { %769 = vset.pattern.permute.xlu1 %v830_v35  ;;  %v144_v16 = vmul.f32 %v1090_v7, %v77_v59 }
  0x98   :  { %431 = vperm.xlu1 %769, %v275_v55  }
  0x99   :  { %v1073_v60 = vpop.permute.xlu1 %121 }
  0x9a   :  { %v87_v61 = vpop.permute.xlu0 %86  ;;  %665 = vperm.xlu0 %795, %v1048_v50  }
  0x9b   :  { %v146_v21 = vmul.f32 %v1090_v7, %v87_v61 }
  0x9c   :  { %771 = vset.pattern.permute.xlu1 %v831_v37 }
  0x9d   :  { %532 = vperm.xlu1 %771, %v275_v55   ;;  %v1077_v62 = vpop.permute.xlu1 %131 }
  0x9e   :  { %v97_v63 = vpop.permute.xlu0 %96  ;;  %799 = vset.pattern.permute.xlu0 %v829_v3 }
  0x9f   :  { %v148_v27 = vmul.f32 %v1090_v7, %v97_v63 }
  0xa1   :  { %772 = vset.pattern.permute.xlu1 %v829_v3  ;;  %v164_v0 = vpop.permute.xlu1 %163 }
  0xa2   :  { %327 = vperm.xlu1 %772, %v1029_v44   ;;  %v107_v1 = vpop.permute.xlu0 %106  ;;  %v237_v23 = vadd.f32 %v164_v0, %v141_v18 }
  0xa3   :  { %v150_v34 = vmul.f32 %v1090_v7, %v107_v1 }
  0xa4   :  { %v253_v29 = vmax.f32 %v237_v23, 0.0 }
  0xa5   :  { %v1082_v4 = vpop.permute.xlu1 %173 }
  0xa6   :  { %773 = vset.pattern.permute.xlu1 %v828_v2  ;;  %v117_v5 = vpop.permute.xlu0 %116 }
  0xa7   :  { %633 = vperm.xlu1 %773, %v275_v55   ;;  %v152_v42 = vmul.f32 %v1090_v7, %v117_v5 }
  0xa9   :  { %v1085_v6 = vpop.permute.xlu1 %183 }
  0xaa   :  { %v1092_v8 = vpop.permute.xlu0 %126 }
  0xab   :  { %774 = vset.pattern.permute.xlu1 %v831_v37 }
  0xac   :  { %536 = vperm.xlu1 %774, %v1029_v44  }
  0xad   :  { %v1097_v10 = vpop.permute.xlu1 %193 }
  0xae   :  { %v159_v11 = vpop.permute.xlu0 %158 }
  0xaf   :  { %v236_v12 = vadd.f32 %v159_v11, %v140_v9 }
  0xb0   :  { %775 = vset.pattern.permute.xlu1 %v830_v35 }
  0xb1   :  { %v1100_v13 = vmax.f32 %v236_v12, 0.0  ;;  %439 = vperm.xlu1 %775, %v991_v39   ;;  %v1103_v14 = vpop.permute.xlu1 %203 }
  0xb2   :  { %v169_v15 = vpop.permute.xlu0 %168 }
  0xb3   :  { %v668_v17 = vmul.f32 %v606_v46, %v1100_v13  ;;  %v142_v46 = vmul.f32 %v1090_v7, %v1031_v45 }
  0xb5   :  { %776 = vset.pattern.permute.xlu1 %v828_v2  ;;  %v1109_v19 = vpop.permute.xlu1 %213  ;;  %v238_v55 = vadd.f32 %v169_v15, %v142_v46 }
  0xb6   :  { %637 = vperm.xlu1 %776, %v1029_v44   ;;  %v179_v20 = vpop.permute.xlu0 %178 }
  0xb7   :  { %v1113_v22 = vadd.f32 %v179_v20, %v144_v16  ;;  %v254_v63 = vmax.f32 %v238_v55, 0.0 }
  0xb9   :  { %v1118_v25 = vpop.permute.xlu1 %223 }
  0xba   :  { %777 = vset.pattern.permute.xlu1 %v829_v3  ;;  %v189_v26 = vpop.permute.xlu0 %188 }
  0xbb   :  { %v242_v28 = vadd.f32 %v189_v26, %v146_v21  ;;  %337 = vperm.xlu1 %777, %v278_v24   ;;  %v280_v21 = vld [vmem:[%s1249_s3 + $0x60] sm:$0xff] }
  0xbd   :  { %v1122_v30 = vmax.f32 %v242_v28, 0.0  ;;  %v293_v31 = vpop.permute.xlu1 %292 }
  0xbe   :  { %v366_v32 = vmul.f32 %v293_v31, %v253_v29  ;;  %v199_v33 = vpop.permute.xlu0 %198 }
  0xbf   :  { %v1125_v36 = vadd.f32 %v199_v33, %v148_v27  ;;  %778 = vset.pattern.permute.xlu1 %v830_v35  ;;  %v1130_v38 = vmul.f32 %v1055_v52, %v1122_v30 }
  0xc0   :  { %443 = vperm.xlu1 %778, %v278_v24  }
  0xc2   :  { %v408_v39 = vpop.permute.xlu1 %407  ;;  %v209_v40 = vpop.permute.xlu0 %208 }
  0xc3   :  { %v1133_v43 = vmul.f32 %v408_v39, %v253_v29  ;;  %v1135_v44 = vadd.f32 %v209_v40, %v150_v34 }
  0xc4   :  { %779 = vset.pattern.permute.xlu1 %v831_v37 }
  0xc5   :  { %544 = vperm.xlu1 %779, %v278_v24  }
  0xc6   :  { %v219_v54 = vpop.permute.xlu0 %218 }
  0xc7   :  { %v1140_v57 = vadd.f32 %v219_v54, %v152_v42  ;;  %v505_v52 = vpop.permute.xlu1 %504  ;;  %v53_v42 = vld [vmem:[%s1248_s2 + $0x78] sm:$0xff] }
  0xc8   :  { %v567_v59 = vmul.f32 %v505_v52, %v1100_v13 }
  0xc9   :  { %780 = vset.pattern.permute.xlu1 %v829_v3 }
  0xca   :  { %342 = vperm.xlu1 %780, %v1037_v47   ;;  %v288_v61 = vpop.permute.xlu0 %287 }
  0xcb   :  { %v365_v0 = vmul.f32 %v288_v61, %v1100_v13 }
  0xcc   :  { %v298_v1 = vpop.permute.xlu1 %297 }
  0xcd   :  { %v381_v5 = vadd.f32 %v366_v32, %v365_v0  ;;  %v367_v9 = vmul.f32 %v298_v1, %v254_v63 }
  0xce   :  { %781 = vset.pattern.permute.xlu1 %v828_v2  ;;  %v303_v45 = vpop.permute.xlu0 %302 }
  0xcf   :  { %v382_v11 = vadd.f32 %v381_v5, %v367_v9  ;;  %645 = vperm.xlu1 %781, %v278_v24  }
  0xd1   :  { %v412_v12 = vpop.permute.xlu1 %411 }
  0xd2   :  { %v1147_v15 = vmul.f32 %v412_v12, %v254_v63  ;;  %v1149_v16 = vpop.permute.xlu0 %317 }
  0xd3   :  { %782 = vset.pattern.permute.xlu1 %v831_v37 }
  0xd4   :  { %548 = vperm.xlu1 %782, %v1037_v47   ;;  %v143_v47 = vmul.f32 %v1090_v7, %v1040_v48  ;;  %v256_v48 = vmax.f32 %v1113_v22, 0.0 }
  0xd6   :  { %v610_v18 = vpop.permute.xlu1 %609  ;;  %v1153_v20 = vpop.permute.xlu0 %332  ;;  %v239_v32 = vadd.f32 %v1082_v4, %v143_v47 }
  0xd7   :  { %v669_v23 = vmul.f32 %v610_v18, %v253_v29 }
  0xd8   :  { %783 = vset.pattern.permute.xlu1 %v829_v3  ;;  %v255_v34 = vmax.f32 %v239_v32, 0.0 }
  0xd9   :  { %v684_v24 = vadd.f32 %v669_v23, %v668_v17  ;;  %347 = vperm.xlu1 %783, %v280_v21  }
  0xda   :  { %v1159_v26 = vpop.permute.xlu0 %228  ;;  %v368_v55 = vmul.f32 %v303_v45, %v255_v34  ;;  %v671_v0 = vmul.f32 %v1043_v49, %v255_v34  ;;  %v145_v49 = vmul.f32 %v1090_v7, %v1052_v51 }
  0xdb   :  { %v513_v27 = vpop.permute.xlu1 %512 }
  0xdc   :  { %v569_v28 = vmul.f32 %v513_v27, %v254_v63  ;;  %v383_v5 = vadd.f32 %v382_v11, %v368_v55  ;;  %v241_v11 = vadd.f32 %v1085_v6, %v145_v49 }
  0xdd   :  { %784 = vset.pattern.permute.xlu1 %v830_v35 }
  0xde   :  { %451 = vperm.xlu1 %784, %v280_v21   ;;  %v1164_v31 = vpop.permute.xlu0 %352  ;;  %v257_v32 = vmax.f32 %v241_v11, 0.0 }
  0xe0   :  { %v416_v33 = vpop.permute.xlu1 %415 }
  0xe2   :  { %785 = vset.pattern.permute.xlu1 %v831_v37 }
  0xe3   :  { %552 = vperm.xlu1 %785, %v280_v21   ;;  %v509_v17 = vpop.permute.xlu0 %508 }
  0xe4   :  { %v568_v39 = vmul.f32 %v509_v17, %v253_v29 }
  0xe5   :  { %v614_v40 = vpop.permute.xlu1 %613 }
  0xe6   :  { %v583_v46 = vadd.f32 %v568_v39, %v567_v59  ;;  %v670_v54 = vmul.f32 %v614_v40, %v254_v63  ;;  %v371_v39 = vmul.f32 %v1149_v16, %v1122_v30 }
  0xe7   :  { %786 = vset.pattern.permute.xlu1 %v829_v3  ;;  %v517_v4 = vpop.permute.xlu0 %516 }
  0xe8   :  { %v685_v52 = vadd.f32 %v684_v24, %v670_v54  ;;  %v584_v61 = vadd.f32 %v583_v46, %v569_v28  ;;  %233 = vperm.xlu1 %786, %v53_v42   ;;  %v570_v18 = vmul.f32 %v517_v4, %v255_v34  ;;  %v469_v46 = vmul.f32 %v416_v33, %v255_v34 }
  0xea   :  { %v308_v1 = vpop.permute.xlu1 %307  ;;  %v686_v29 = vadd.f32 %v685_v52, %v671_v0  ;;  %v585_v27 = vadd.f32 %v584_v61, %v570_v18 }
  0xeb   :  { %v369_v9 = vmul.f32 %v308_v1, %v256_v48  ;;  %v529_v12 = vpop.permute.xlu0 %528 }
  0xec   :  { %788 = vset.pattern.permute.xlu1 %v830_v35  ;;  %v573_v1 = vmul.f32 %v529_v12, %v1122_v30 }
  0xed   :  { %v384_v59 = vadd.f32 %v383_v5, %v369_v9  ;;  %455 = vperm.xlu1 %788, %v1002_v41   ;;  %v282_v41 = vld [vmem:[%s1249_s3 + $0x70] sm:$0xff] }
  0xef   :  { %v420_v22 = vpop.permute.xlu1 %419  ;;  %v1176_v63 = vpop.permute.xlu0 %540 }
  0xf0   :  { %v470_v45 = vmul.f32 %v420_v22, %v256_v48 }
  0xf1   :  { %789 = vset.pattern.permute.xlu1 %v828_v2 }
  0xf2   :  { %653 = vperm.xlu1 %789, %v280_v21  }
  0xf3   :  { %v1181_v23 = vpop.permute.xlu0 %556 }
  0xf4   :  { %v521_v24 = vpop.permute.xlu1 %520 }
  0xf5   :  { %v571_v28 = vmul.f32 %v521_v24, %v256_v48 }
  0xf6   :  { %791 = vset.pattern.permute.xlu1 %v829_v3 }
  0xf7   :  { %v586_v47 = vadd.f32 %v585_v27, %v571_v28  ;;  %357 = vperm.xlu1 %791, %v282_v41  }
  0xf8   :  { %v404_v17 = vpop.permute.xlu0 %403 }
  0xf9   :  { %v466_v51 = vmul.f32 %v404_v17, %v1100_v13  ;;  %v313_v21 = vpop.permute.xlu1 %312 }
  0xfa   :  { %v370_v6 = vmul.f32 %v313_v21, %v257_v32 }
  0xfb   :  { %v482_v40 = vadd.f32 %v1133_v43, %v466_v51  ;;  %792 = vset.pattern.permute.xlu1 %v830_v35 }
  0xfc   :  { %v385_v42 = vadd.f32 %v384_v59, %v370_v6  ;;  %459 = vperm.xlu1 %792, %v282_v41   ;;  %v424_v43 = vpop.permute.xlu0 %423 }
  0xfd   :  { %v483_v54 = vadd.f32 %v482_v40, %v1147_v15  ;;  %v471_v15 = vmul.f32 %v424_v43, %v257_v32 }
  0xfe   :  { %v622_v55 = vpop.permute.xlu1 %621  ;;  %v386_v4 = vadd.f32 %v385_v42, %v371_v39 }
  0xff   :  { %v484_v52 = vadd.f32 %v483_v54, %v469_v46  ;;  %v672_v61 = vmul.f32 %v622_v55, %v256_v48 }
 0x100   :  { %793 = vset.pattern.permute.xlu1 %v831_v37  ;;  %v436_v27 = vpop.permute.xlu0 %435 }
 0x101   :  { %v485_v13 = vadd.f32 %v484_v52, %v470_v45  ;;  %v687_v0 = vadd.f32 %v686_v29, %v672_v61  ;;  %560 = vperm.xlu1 %793, %v282_v41   ;;  %v147_v29 = vmul.f32 %v1090_v7, %v1058_v53 }
 0x103   :  { %v525_v16 = vpop.permute.xlu1 %524  ;;  %v486_v9 = vadd.f32 %v485_v13, %v471_v15  ;;  %v243_v12 = vadd.f32 %v1097_v10, %v147_v29  ;;  %v260_v10 = vmax.f32 %v1125_v36, 0.0 }
 0x104   :  { %v572_v5 = vmul.f32 %v525_v16, %v257_v32  ;;  %v448_v55 = vpop.permute.xlu0 %447 }
 0x105   :  { %794 = vset.pattern.permute.xlu1 %v829_v3  ;;  %v259_v49 = vmax.f32 %v243_v12, 0.0  ;;  %v474_v28 = vmul.f32 %v436_v27, %v260_v10 }
 0x106   :  { %v587_v35 = vadd.f32 %v586_v47, %v572_v5  ;;  %362 = vperm.xlu1 %794, %v1048_v50   ;;  %v149_v47 = vmul.f32 %v1090_v7, %v1065_v56 }
 0x108   :  { %v428_v33 = vpop.permute.xlu1 %427  ;;  %v588_v34 = vadd.f32 %v587_v35, %v573_v1 }
 0x109   :  { %v472_v48 = vmul.f32 %v428_v33, %v1122_v30 }
 0x10a   :  { %796 = vset.pattern.permute.xlu1 %v828_v2  ;;  %v284_v2 = vld [vmem:[%s1250_s4] sm:$0xf]  ;;  %s832_s4 = smov [#allocation2]  }
 0x10b   :  { %v487_v59 = vadd.f32 %v486_v9, %v472_v48  ;;  %661 = vperm.xlu1 %796, %v282_v41   ;;  %v151_v9 = vmul.f32 %v1090_v7, %v1069_v58  ;;  %s736_s13 = sshll.u32 %s832_s4, 4  ;;  %s737_s13 = int_to_ptr.vmem [resolvable:$true] %s736_s13 }
 0x10c   :  { %s804_s14 = scalar_lea.vmem %s737_s13, 64  ;;  %p809_p1 = scmp.lt.s32.totalorder %s737_s13, %s737_s13 }
 0x10d   :  { %v626_v22 = vpop.permute.xlu1 %625  ;;  %p805_p0 = scmp.ne.s32.totalorder %s737_s13, %s804_s14  ;;  %p810_p2 = scmp.lt.s32.totalorder %s804_s14, %s804_s14 }
 0x10e   :  { %v673_v45 = vmul.f32 %v626_v22, %v257_v32 }
 0x10f   :  { %797 = vset.pattern.permute.xlu1 %v831_v37  ;;  %p811_p3 = por %p810_p2, %p809_p1 }
 0x110   :  { %v688_v18 = vadd.f32 %v687_v0, %v673_v45  ;;  %564 = vperm.xlu1 %797, %v1048_v50   ;;  %v1216_v0 = vpop.permute.xlu0 %463 }
 0x111   :  { %p812_p4 = pnand %p811_p3, %p805_p0 }
 0x112   :  { %v323_v11 = vpop.permute.xlu1 %322  ;;  %v689_v30 = vadd.f32 %v688_v18, %v1130_v38  ;;  %v245_v38 = vadd.f32 %v1103_v14, %v149_v47 }
 0x113   :  { %v372_v53 = vmul.f32 %v323_v11, %v259_v49 }
 0x114   :  { %798 = vset.pattern.permute.xlu1 %v829_v3  ;;  %v261_v3 = vmax.f32 %v245_v38, 0.0  ;;  %v642_v5 = vpop.permute.xlu0 %641 }
 0x115   :  { %v387_v24 = vadd.f32 %v386_v4, %v372_v53  ;;  %713 = vperm.xlu1 %798, %v284_v2  }
 0x116   :  { %v374_v40 = vmul.f32 %v1153_v20, %v261_v3  ;;  %v576_v56 = vmul.f32 %v1176_v63, %v261_v3  ;;  %v677_v15 = vmul.f32 %v642_v5, %v261_v3 }
 0x117   :  { %v432_v41 = vpop.permute.xlu1 %431 }
 0x118   :  { %v473_v37 = vmul.f32 %v432_v41, %v259_v49 }
 0x11a   :  { %v488_v50 = vadd.f32 %v487_v59, %v473_v37  ;;  %v247_v59 = vadd.f32 %v1109_v19, %v151_v9  ;;  %v650_v37 = vpop.permute.xlu0 %649  ;;  %v153_v19 = vmul.f32 %v1090_v7, %v1073_v60 }
 0x11c   :  { %v533_v32 = vpop.permute.xlu1 %532  ;;  %v489_v17 = vadd.f32 %v488_v50, %v474_v28  ;;  %v263_v45 = vmax.f32 %v247_v59, 0.0 }
 0x11d   :  { %v574_v51 = vmul.f32 %v533_v32, %v259_v49 }
 0x11e   :  { %v679_v28 = vmul.f32 %v650_v37, %v263_v45 }
 0x11f   :  { %v589_v21 = vadd.f32 %v588_v34, %v574_v51  ;;  %v262_v34 = vmax.f32 %v1135_v44, 0.0  ;;  %v249_v51 = vadd.f32 %v1118_v25, %v153_v19 }
 0x121   :  { %v328_v39 = vpop.permute.xlu1 %327 }
 0x122   :  { %v373_v6 = vmul.f32 %v328_v39, %v260_v10 }
 0x124   :  { %v388_v36 = vadd.f32 %v387_v24, %v373_v6 }
 0x126   :  { %v634_v42 = vpop.permute.xlu1 %633  ;;  %v389_v46 = vadd.f32 %v388_v36, %v374_v40 }
 0x127   :  { %v675_v54 = vmul.f32 %v634_v42, %v259_v49  ;;  %v477_v49 = vmul.f32 %v448_v55, %v263_v45 }
 0x129   :  { %v690_v4 = vadd.f32 %v689_v30, %v675_v54 }
 0x12b   :  { %v537_v52 = vpop.permute.xlu1 %536 }
 0x12c   :  { %v575_v61 = vmul.f32 %v537_v52, %v260_v10 }
 0x12e   :  { %v590_v13 = vadd.f32 %v589_v21, %v575_v61  ;;  %v264_v21 = vmax.f32 %v1140_v57, 0.0  ;;  %v154_v57 = vmul.f32 %v1090_v7, %v1092_v8 }
 0x130   :  { %v440_v14 = vpop.permute.xlu1 %439  ;;  %v591_v16 = vadd.f32 %v590_v13, %v576_v56 }
 0x131   :  { %v475_v1 = vmul.f32 %v440_v14, %v261_v3  ;;  %v265_v3 = vmax.f32 %v249_v51, 0.0 }
 0x133   :  { %v490_v43 = vadd.f32 %v489_v17, %v475_v1  ;;  %v378_v40 = vmul.f32 %v1164_v31, %v265_v3  ;;  %v580_v52 = vmul.f32 %v1181_v23, %v265_v3  ;;  %v250_v31 = vadd.f32 %v1159_v26, %v154_v57  ;;  %v658_v1 = vpop.permute.xlu0 %657 }
 0x135   :  { %v638_v35 = vpop.permute.xlu1 %637  ;;  %v266_v23 = vmax.f32 %v250_v31, 0.0 }
 0x136   :  { %v676_v20 = vmul.f32 %v638_v35, %v260_v10  ;;  %v155_v35 = vmul.f32 %v1090_v7, %v1077_v62 }
 0x138   :  { %v691_v33 = vadd.f32 %v690_v4, %v676_v20  ;;  %v681_v20 = vmul.f32 %v658_v1, %v265_v3 }
 0x13a   :  { %v338_v48 = vpop.permute.xlu1 %337  ;;  %v692_v29 = vadd.f32 %v691_v33, %v677_v15 }
 0x13b   :  { %v375_v63 = vmul.f32 %v338_v48, %v262_v34 }
 0x13d   :  { %v390_v12 = vadd.f32 %v389_v46, %v375_v63 }
 0x13f   :  { %v444_v22 = vpop.permute.xlu1 %443 }
 0x140   :  { %v476_v18 = vmul.f32 %v444_v22, %v262_v34 }
 0x142   :  { %v491_v11 = vadd.f32 %v490_v43, %v476_v18 }
 0x144   :  { %v545_v2 = vpop.permute.xlu1 %544  ;;  %v492_v30 = vadd.f32 %v491_v11, %v477_v49 }
 0x145   :  { %v577_v53 = vmul.f32 %v545_v2, %v262_v34 }
 0x147   :  { %v592_v24 = vadd.f32 %v591_v16, %v577_v53 }
 0x149   :  { %v343_v10 = vpop.permute.xlu1 %342 }
 0x14a   :  { %v376_v44 = vmul.f32 %v343_v10, %v263_v45 }
 0x14c   :  { %v391_v41 = vadd.f32 %v390_v12, %v376_v44 }
 0x14e   :  { %v646_v58 = vpop.permute.xlu1 %645 }
 0x14f   :  { %v678_v27 = vmul.f32 %v646_v58, %v262_v34 }
 0x151   :  { %v693_v50 = vadd.f32 %v692_v29, %v678_v27 }
 0x153   :  { %v549_v47 = vpop.permute.xlu1 %548  ;;  %v694_v32 = vadd.f32 %v693_v50, %v679_v28 }
 0x154   :  { %v578_v17 = vmul.f32 %v549_v47, %v263_v45 }
 0x156   :  { %v593_v38 = vadd.f32 %v592_v24, %v578_v17  ;;  %v666_v24 = vpop.permute.xlu0 %665 }
 0x158   :  { %v348_v39 = vpop.permute.xlu1 %347 }
 0x159   :  { %v377_v6 = vmul.f32 %v348_v39, %v264_v21 }
 0x15b   :  { %v392_v36 = vadd.f32 %v391_v41, %v377_v6 }
 0x15d   :  { %v452_v42 = vpop.permute.xlu1 %451  ;;  %v393_v46 = vadd.f32 %v392_v36, %v378_v40 }
 0x15e   :  { %v478_v54 = vmul.f32 %v452_v42, %v264_v21 }
 0x160   :  { %v493_v55 = vadd.f32 %v492_v30, %v478_v54 }
 0x162   :  { %v553_v4 = vpop.permute.xlu1 %552 }
 0x163   :  { %v579_v60 = vmul.f32 %v553_v4, %v264_v21 }
 0x165   :  { %v594_v61 = vadd.f32 %v593_v38, %v579_v60 }
 0x167   :  { %v234_v56 = vpop.permute.xlu1 %233  ;;  %v595_v25 = vadd.f32 %v594_v61, %v580_v52 }
 0x168   :  { %v251_v33 = vadd.f32 %v234_v56, %v155_v35 }
 0x16a   :  { %v267_v63 = vmax.f32 %v251_v33, 0.0 }
 0x16c   :  { %v456_v13 = vpop.permute.xlu1 %455  ;;  %v481_v12 = vmul.f32 %v1216_v0, %v267_v63  ;;  %v683_v27 = vmul.f32 %v666_v24, %v267_v63 }
 0x16d   :  { %v479_v14 = vmul.f32 %v456_v13, %v265_v3 }
 0x16f   :  { %v494_v16 = vadd.f32 %v493_v55, %v479_v14 }
 0x171   :  { %v654_v43 = vpop.permute.xlu1 %653 }
 0x172   :  { %v680_v5 = vmul.f32 %v654_v43, %v264_v21 }
 0x174   :  { %v695_v15 = vadd.f32 %v694_v32, %v680_v5 }
 0x176   :  { %v358_v34 = vpop.permute.xlu1 %357  ;;  %v696_v9 = vadd.f32 %v695_v15, %v681_v20 }
 0x177   :  { %v379_v48 = vmul.f32 %v358_v34, %v266_v23 }
 0x179   :  { %v394_v29 = vadd.f32 %v393_v46, %v379_v48 }
 0x17b   :  { %v460_v8 = vpop.permute.xlu1 %459 }
 0x17c   :  { %v480_v59 = vmul.f32 %v460_v8, %v266_v23 }
 0x17e   :  { %v495_v26 = vadd.f32 %v494_v16, %v480_v59 }
 0x180   :  { %v496_v22 = vadd.f32 %v495_v26, %v481_v12  ;;  %v561_v45 = vpop.permute.xlu1 %560 }
 0x181   :  { %v581_v18 = vmul.f32 %v561_v45, %v266_v23 }
 0x182   :  { %v497_v49 = vrot.slane %v496_v22, 4 }
 0x183   :  { %v596_v11 = vadd.f32 %v595_v25, %v581_v18 }
 0x184   :  { %v498_v62 = vadd.f32 %v497_v49, %v496_v22 }
 0x185   :  { %v363_v7 = vpop.permute.xlu1 %362 }
 0x186   :  { %v380_v2 = vmul.f32 %v363_v7, %v267_v63  ;;  %v499_v30 = vrot.slane %v498_v62, 2 }
 0x188   :  { %v395_v53 = vadd.f32 %v394_v29, %v380_v2  ;;  %v500_v37 = vadd.f32 %v499_v30, %v498_v62 }
 0x18a   :  { %v396_v10 = vrot.slane %v395_v53, 4  ;;  %v662_v44 = vpop.permute.xlu1 %661  ;;  %v501_v47 = vrot.slane %v500_v37, 1 }
 0x18b   :  { %v682_v41 = vmul.f32 %v662_v44, %v266_v23 }
 0x18c   :  { %v397_v58 = vadd.f32 %v396_v10, %v395_v53  ;;  %v502_v40 = vadd.f32 %v501_v47, %v500_v37 }
 0x18d   :  { %v697_v28 = vadd.f32 %v696_v9, %v682_v41 }
 0x18e   :  { %v398_v0 = vrot.slane %v397_v58, 2 }
 0x18f   :  { %v698_v50 = vadd.f32 %v697_v28, %v683_v27  ;;  %v565_v19 = vpop.permute.xlu1 %564 }
 0x190   :  { %v399_v32 = vadd.f32 %v398_v0, %v397_v58  ;;  %v582_v17 = vmul.f32 %v565_v19, %v267_v63 }
 0x191   :  { %v699_v51 = vrot.slane %v698_v50, 4 }
 0x192   :  { %v400_v38 = vrot.slane %v399_v32, 1  ;;  %v597_v21 = vadd.f32 %v596_v11, %v582_v17 }
 0x193   :  { %v700_v39 = vadd.f32 %v699_v51, %v698_v50 }
 0x194   :  { %v401_v3 = vadd.f32 %v400_v38, %v399_v32  ;;  %v598_v6 = vrot.slane %v597_v21, 4  ;;  %v714_v56 = vpop.permute.xlu1 %713 }
 0x195   :  { %v701_v36 = vrot.slane %v700_v39, 2 }
 0x196   :  { %v599_v42 = vadd.f32 %v598_v6, %v597_v21  ;;  %v706_v46 = vsel %vm705_vm0, %v401_v3, %v502_v40 }
 0x197   :  { %v702_v54 = vadd.f32 %v701_v36, %v700_v39 }
 0x198   :  { %v600_v55 = vrot.slane %v599_v42, 2 }
 0x199   :  { %v703_v60 = vrot.slane %v702_v54, 1 }
 0x19a   :  { %v601_v4 = vadd.f32 %v600_v55, %v599_v42 }
 0x19b   :  { %v704_v25 = vadd.f32 %v703_v60, %v702_v54 }
 0x19c   :  { %v602_v52 = vrot.slane %v601_v4, 1 }
 0x19e   :  { %v603_v61 = vadd.f32 %v602_v52, %v601_v4 }
 0x1a0   :  { %v708_v13 = vsel %vm707_vm1, %v706_v46, %v603_v61 }
 0x1a1   :  { %v710_v57 = vsel %vm709_vm2, %v708_v13, %v704_v25 }
 0x1a2   :  { %v716_v14 = vadd.f32 %v714_v56, %v710_v57 }
 0x1a4   :  { %v718_v16 = vsel %vm717_vm3, %v716_v14, -inf }
 0x1a5   :  { %719 = vmax.xlane.f32.xlu1 %v718_v16 }
 0x232   :  { %v720_v31 = vpop.xlane.xlu1 %719 }
 0x233   :  { %v721_v1 = vsub.f32 %v716_v14, %v720_v31 }
 0x235   :  { %v722_v43 = vmul.f32 1.442695, %v721_v1 }
 0x237   :  { %800 = vpow2.f32 %v722_v43 }
 0x241   :  { %v801_v5 = vpop.eup %800 }
 0x242   :  { %v724_v35 = vsel %vm717_vm3, %v801_v5, 0.0 }
 0x243   :  { %725 = vadd.xlane.f32.xlu0 %v724_v35 }
 0x2d0   :  { %v726_v20 = vpop.xlane.xlu0 %725 }
 0x2d1   :  { %802 = vrcp.f32 %v726_v20 }
 0x2db   :  { %v803_v15 = vpop.eup %802 }
 0x2dc   :  { %v728_v23 = vmul.f32 %v803_v15, %v801_v5 }
 0x2de   :  { %729 = vst [vmem:[#allocation2] sm:$0xf] %v728_v23 }
 0x2df   :  { %815 = shalt.err (!%p812_p4)
}
 0x2e0   :  { %s816_s17 = scalar_lea.hbm %s1251_s5, 64 }
 0x2e1   :  { %p817_p5 = scmp.ne.s32.totalorder %s1251_s5, %s816_s17  ;;  %p820_p6 = scmp.lt.u32.totalorder %s816_s17, %s1251_s5 }
 0x2e3   :  { %p822_p7 = pnand %p820_p6, %p817_p5 }
 0x2e5   :  { %825 = shalt.err (!%p822_p7)
}
 0x2e6   :  { %739 = dma.vmem_to_hbm [thread:$0]  %s737_s13, 64, %s1251_s5, [#allocation3]  }
 0x2e7   :  { %826 = dma.done.wait [#allocation3], 64  }
 0x2e8   :  { %827 = vsyncadd [#allocation3], 4294967232 }
 0x2e9   :  { %743 = vsyncpa [#allocation3], 1 }

</bundles_post_ra>
